<compile_context>
chip_gen: v7x
topology: tpu7x:2x2x1
jax: 0.10.0
libtpu: 0.0.40
codegen_flags: <defaults>
</compile_context>

<pallas_src>
import jax
import jax.numpy as jnp
from jax.experimental import pallas as pl
from jax.experimental.pallas import tpu as pltpu

LANE = 128     # TPU lane width: hidden (contraction) dim padded to this.
SUBLANE = 8    # sublane width: action (output-row) dim padded to this.


def _round_up(x, m):
    return (x + m - 1) // m * m


# ----------------------------------------------------------------------------
# Kernel: one batch tile of the transposed 3-layer MLP.
# All activations are (features, batch_tile); lane dim = batch (dense).
# ----------------------------------------------------------------------------
def dqn_kernel(xT_ref, w1t_ref, b1_ref, w2t_ref, b2_ref, w3t_ref, b3_ref, o_ref):
    # Layer 1: (hidden_pad, in) @ (in, tb) -> (hidden_pad, tb), f32 accumulate.
    h1 = jnp.dot(w1t_ref[...], xT_ref[...], preferred_element_type=jnp.float32)
    h1 = jnp.maximum(h1 + b1_ref[...], 0.0)

    # Layer 2: (hidden_pad, hidden_pad) @ (hidden_pad, tb).
    h2 = jnp.dot(w2t_ref[...], h1.astype(jnp.bfloat16),
                 preferred_element_type=jnp.float32)
    h2 = jnp.maximum(h2 + b2_ref[...], 0.0)

    # Layer 3: (act_pad, hidden_pad) @ (hidden_pad, tb) -> Q-values transposed.
    q = jnp.dot(w3t_ref[...], h2.astype(jnp.bfloat16),
                preferred_element_type=jnp.float32)
    o_ref[...] = (q + b3_ref[...]).astype(o_ref.dtype)


# ----------------------------------------------------------------------------
# Parameter preparation: transpose, zero-pad, cast matmul weights to bf16.
# ----------------------------------------------------------------------------
def prepare_params(p):
    """p: dict of (in, out)-layout f32 weights and (1, out) f32 biases."""
    hidden = p["w1"].shape[1]
    n_actions = p["w3"].shape[1]
    hp = _round_up(hidden, LANE)
    ap = _round_up(n_actions, SUBLANE)

    def padT(w, rows_to, cols_to):
        wt = w.T  # (out, in)
        return jnp.pad(wt, ((0, rows_to - wt.shape[0]),
                            (0, cols_to - wt.shape[1]))).astype(jnp.bfloat16)

    def pad_bias(b, rows_to):
        bc = b.reshape(-1, 1)  # (out, 1), stays f32 for the elementwise path
        return jnp.pad(bc, ((0, rows_to - bc.shape[0]), (0, 0)))

    return {
        "w1t": padT(p["w1"], hp, p["w1"].shape[0]),   # (hp, input_size) bf16
        "b1":  pad_bias(p["b1"], hp),                 # (hp, 1) f32
        "w2t": padT(p["w2"], hp, hp),                 # (hp, hp) bf16
        "b2":  pad_bias(p["b2"], hp),                 # (hp, 1) f32
        "w3t": padT(p["w3"], ap, hp),                 # (ap, hp) bf16
        "b3":  pad_bias(p["b3"], ap),                 # (ap, 1) f32
        "n_actions": n_actions,
    }


def _tile_batch(B, block_b):
    """Pick a 128-multiple batch tile; prefer >=2 grid steps (v7x megacore)."""
    b128 = _round_up(B, LANE)
    tb = min(_round_up(block_b, LANE), b128)
    if b128 >= 2 * LANE:
        tb = min(tb, _round_up(b128 // 2, LANE))
    b_pad = _round_up(B, tb)
    return tb, b_pad


# ----------------------------------------------------------------------------
# Forward pass wrapper.
# ----------------------------------------------------------------------------
def dqn_forward(x, pp, *, block_b=4096, min_pallas_batch=256, force_pallas=False):
    """x: (B, input_size) float32.  pp: output of prepare_params."""
    n_actions = pp["n_actions"]
    B, in_features = x.shape

    if B < min_pallas_batch and not force_pallas:
        # Small-batch fallback: fused XLA path (same bf16/f32 math as kernel).
        xb = x.astype(jnp.bfloat16)
        h = jnp.maximum(jnp.dot(xb, pp["w1t"].T, preferred_element_type=jnp.float32)
                        + pp["b1"].T, 0.0)
        h = jnp.maximum(jnp.dot(h.astype(jnp.bfloat16), pp["w2t"].T,
                                preferred_element_type=jnp.float32) + pp["b2"].T, 0.0)
        q = jnp.dot(h.astype(jnp.bfloat16), pp["w3t"].T,
                    preferred_element_type=jnp.float32) + pp["b3"].T
        return q[:, :n_actions]

    tb, b_pad = _tile_batch(B, block_b)
    grid = (b_pad // tb,)

    # Pad batch, cast to bf16, transpose so batch is the lane (minor) dim.
    xT = jnp.pad(x, ((0, b_pad - B), (0, 0))).astype(jnp.bfloat16).T  # (in, b_pad)

    ap = pp["w3t"].shape[0]

    def const_spec(arr):
        return pl.BlockSpec(arr.shape, lambda i: (0, 0))

    outT = pl.pallas_call(
        dqn_kernel,
        out_shape=jax.ShapeDtypeStruct((ap, b_pad), jnp.float32),
        grid_spec=pltpu.PrefetchScalarGridSpec(
            num_scalar_prefetch=0,
            grid=grid,
            in_specs=[
                pl.BlockSpec((in_features, tb), lambda i: (0, i)),  # xT: streamed
                const_spec(pp["w1t"]), const_spec(pp["b1"]),        # VMEM-resident
                const_spec(pp["w2t"]), const_spec(pp["b2"]),
                const_spec(pp["w3t"]), const_spec(pp["b3"]),
            ],
            out_specs=pl.BlockSpec((ap, tb), lambda i: (0, i)),
        ),
        compiler_params=pltpu.CompilerParams(
            dimension_semantics=("parallel",),
            vmem_limit_bytes=32 * 1024 * 1024,
        ),
    )(xT, pp["w1t"], pp["b1"], pp["w2t"], pp["b2"], pp["w3t"], pp["b3"])

    # Drop padded actions / padded batch rows; back to (B, n_actions).
    return outT[:n_actions, :B].T


# ----------------------------------------------------------------------------
# Initialization and references.
# ----------------------------------------------------------------------------
def init_dqn_params(key, input_size, n_actions, hidden=64):
    """PyTorch-style init U(-1/sqrt(fan_in), 1/sqrt(fan_in)).
    Weights (in, out); biases (1, out)."""
    ks = jax.random.split(key, 6)

    def linear(kw, kb, fan_in, fan_out):
        bound = 1.0 / jnp.sqrt(fan_in)
        w = jax.random.uniform(kw, (fan_in, fan_out), jnp.float32, -bound, bound)
        b = jax.random.uniform(kb, (1, fan_out), jnp.float32, -bound, bound)
        return w, b

    w1, b1 = linear(ks[0], ks[1], input_size, hidden)
    w2, b2 = linear(ks[2], ks[3], hidden, hidden)
    w3, b3 = linear(ks[4], ks[5], hidden, n_actions)
    return {"w1": w1, "b1": b1, "w2": w2, "b2": b2, "w3": w3, "b3": b3}


def dqn_reference_f32(x, p):
    h = jnp.maximum(x @ p["w1"] + p["b1"], 0.0)
    h = jnp.maximum(h @ p["w2"] + p["b2"], 0.0)
    return h @ p["w3"] + p["b3"]


def dqn_reference_bf16(x, p):
    def mm(a, w):
        return jnp.dot(a.astype(jnp.bfloat16), w.astype(jnp.bfloat16),
                       preferred_element_type=jnp.float32)
    h = jnp.maximum(mm(x, p["w1"]) + p["b1"], 0.0)
    h = jnp.maximum(mm(h, p["w2"]) + p["b2"], 0.0)
    return mm(h, p["w3"]) + p["b3"]


if __name__ == "__main__":
    key = jax.random.PRNGKey(0)
    k_x, k_xl, k_p = jax.random.split(key, 3)

    # Flappy Bird state-vector DQN: input_size=8, n_actions=2.
    input_size, n_actions = 8, 2
    raw_params = init_dqn_params(k_p, input_size, n_actions)
    pp = prepare_params(raw_params)

    # 1) Tiny batch through the Pallas kernel (forced, single grid step).
    x_small = jax.random.normal(k_x, (2, input_size), dtype=jnp.float32)
    out_small = jax.block_until_ready(dqn_forward(x_small, pp, force_pallas=True))
    assert out_small.shape == (2, n_actions)
    assert jnp.allclose(out_small, dqn_reference_bf16(x_small, raw_params),
                        atol=2e-3, rtol=2e-3), "small-batch mismatch vs bf16 ref"
    assert jnp.allclose(out_small, dqn_reference_f32(x_small, raw_params),
                        atol=5e-2, rtol=5e-2), "small-batch mismatch vs f32 ref"

    # 2) Larger batch exercising the tiled multi-step ("parallel") grid path.
    x_large = jax.random.normal(k_xl, (1024, input_size), dtype=jnp.float32)
    out_large = jax.block_until_ready(dqn_forward(x_large, pp))
    assert out_large.shape == (1024, n_actions)
    assert jnp.allclose(out_large, dqn_reference_bf16(x_large, raw_params),
                        atol=2e-3, rtol=2e-3), "large-batch mismatch vs bf16 ref"
    assert jnp.allclose(out_large, dqn_reference_f32(x_large, raw_params),
                        atol=5e-2, rtol=5e-2), "large-batch mismatch vs f32 ref"

    # 3) Tiny batch via the XLA fallback path (default behaviour for B < 256).
    out_fb = jax.block_until_ready(dqn_forward(x_small, pp))
    assert jnp.allclose(out_fb, dqn_reference_bf16(x_small, raw_params),
                        atol=2e-3, rtol=2e-3), "fallback mismatch vs bf16 ref"

    print("KERNEL_OK")
</pallas_src>

<mosaic_0001>
module attributes {stable_mosaic.version = 11 : i64} {
  func.func @dqn_kernel(%arg0: i32, %arg1: memref<8x128xbf16, #tpu.memory_space<vmem>>, %arg2: memref<128x8xbf16, #tpu.memory_space<vmem>>, %arg3: memref<128x1xf32, #tpu.memory_space<vmem>>, %arg4: memref<128x128xbf16, #tpu.memory_space<vmem>>, %arg5: memref<128x1xf32, #tpu.memory_space<vmem>>, %arg6: memref<8x128xbf16, #tpu.memory_space<vmem>>, %arg7: memref<8x1xf32, #tpu.memory_space<vmem>>, %arg8: memref<8x128xf32, #tpu.memory_space<vmem>>) attributes {dimension_semantics = [#tpu.dimension_semantics<parallel>], iteration_bounds = array<i64: 1>, scalar_prefetch = 0 : i64, scratch_operands = 0 : i64, tpu.core_type = #tpu.core_type<tc>, window_params = [{transform_indices = @transform_0, window_bounds = array<i64: 8, 128>}, {pipeline_mode = #tpu.pipeline_mode<synchronous>, transform_indices = @transform_1, window_bounds = array<i64: 128, 8>}, {pipeline_mode = #tpu.pipeline_mode<synchronous>, transform_indices = @transform_2, window_bounds = array<i64: 128, 1>}, {pipeline_mode = #tpu.pipeline_mode<synchronous>, transform_indices = @transform_3, window_bounds = array<i64: 128, 128>}, {pipeline_mode = #tpu.pipeline_mode<synchronous>, transform_indices = @transform_4, window_bounds = array<i64: 128, 1>}, {pipeline_mode = #tpu.pipeline_mode<synchronous>, transform_indices = @transform_5, window_bounds = array<i64: 8, 128>}, {pipeline_mode = #tpu.pipeline_mode<synchronous>, transform_indices = @transform_6, window_bounds = array<i64: 8, 1>}, {transform_indices = @transform_7, window_bounds = array<i64: 8, 128>}]} {
    %c0 = arith.constant 0 : index
    %c0_0 = arith.constant 0 : index
    %0 = vector.load %arg2[%c0, %c0_0] : memref<128x8xbf16, #tpu.memory_space<vmem>>, vector<128x8xbf16>
    %c0_1 = arith.constant 0 : index
    %c0_2 = arith.constant 0 : index
    %1 = vector.load %arg1[%c0_1, %c0_2] : memref<8x128xbf16, #tpu.memory_space<vmem>>, vector<8x128xbf16>
    %cst = arith.constant dense<0.000000e+00> : vector<128x128xf32>
    %2 = tpu.matmul %0, %1, %cst {dimension_numbers = #tpu.dot_dimension_numbers<[1], [0], [0], [1], [0, 0, 1, 1], [], []>} : vector<128x8xbf16>, vector<8x128xbf16>, vector<128x128xf32> -> vector<128x128xf32>
    %c0_3 = arith.constant 0 : index
    %c0_4 = arith.constant 0 : index
    %3 = vector.load %arg3[%c0_3, %c0_4] : memref<128x1xf32, #tpu.memory_space<vmem>>, vector<128x1xf32>
    %4 = vector.broadcast %3 : vector<128x1xf32> to vector<128x128xf32>
    %5 = arith.addf %2, %4 : vector<128x128xf32>
    %cst_5 = arith.constant 0.000000e+00 : f32
    %6 = vector.broadcast %cst_5 : f32 to vector<128x128xf32>
    %7 = arith.maximumf %5, %6 : vector<128x128xf32>
    %c0_6 = arith.constant 0 : index
    %c0_7 = arith.constant 0 : index
    %8 = vector.load %arg4[%c0_6, %c0_7] : memref<128x128xbf16, #tpu.memory_space<vmem>>, vector<128x128xbf16>
    %9 = arith.truncf %7 : vector<128x128xf32> to vector<128x128xbf16>
    %cst_8 = arith.constant dense<0.000000e+00> : vector<128x128xf32>
    %10 = tpu.matmul %8, %9, %cst_8 {dimension_numbers = #tpu.dot_dimension_numbers<[1], [0], [0], [1], [0, 0, 1, 1], [], []>} : vector<128x128xbf16>, vector<128x128xbf16>, vector<128x128xf32> -> vector<128x128xf32>
    %c0_9 = arith.constant 0 : index
    %c0_10 = arith.constant 0 : index
    %11 = vector.load %arg5[%c0_9, %c0_10] : memref<128x1xf32, #tpu.memory_space<vmem>>, vector<128x1xf32>
    %12 = vector.broadcast %11 : vector<128x1xf32> to vector<128x128xf32>
    %13 = arith.addf %10, %12 : vector<128x128xf32>
    %cst_11 = arith.constant 0.000000e+00 : f32
    %14 = vector.broadcast %cst_11 : f32 to vector<128x128xf32>
    %15 = arith.maximumf %13, %14 : vector<128x128xf32>
    %c0_12 = arith.constant 0 : index
    %c0_13 = arith.constant 0 : index
    %16 = vector.load %arg6[%c0_12, %c0_13] : memref<8x128xbf16, #tpu.memory_space<vmem>>, vector<8x128xbf16>
    %17 = arith.truncf %15 : vector<128x128xf32> to vector<128x128xbf16>
    %cst_14 = arith.constant dense<0.000000e+00> : vector<8x128xf32>
    %18 = tpu.matmul %16, %17, %cst_14 {dimension_numbers = #tpu.dot_dimension_numbers<[1], [0], [0], [1], [0, 0, 1, 1], [], []>} : vector<8x128xbf16>, vector<128x128xbf16>, vector<8x128xf32> -> vector<8x128xf32>
    %c0_15 = arith.constant 0 : index
    %c0_16 = arith.constant 0 : index
    %19 = vector.load %arg7[%c0_15, %c0_16] : memref<8x1xf32, #tpu.memory_space<vmem>>, vector<8x1xf32>
    %20 = vector.broadcast %19 : vector<8x1xf32> to vector<8x128xf32>
    %21 = arith.addf %18, %20 : vector<8x128xf32>
    %c0_17 = arith.constant 0 : index
    %c0_18 = arith.constant 0 : index
    %22 = vector.load %arg8[%c0_17, %c0_18] : memref<8x128xf32, #tpu.memory_space<vmem>>, vector<8x128xf32>
    tpu.vector_store %arg8[%c0_17, %c0_18], %21 {strides = array<i32>} : memref<8x128xf32, #tpu.memory_space<vmem>>, vector<8x128xf32>,
    return
  }
  func.func @transform_0(%arg0: i32) -> (i32, i32) {
    %c0_i32 = arith.constant 0 : i32
    %c0_i32_0 = arith.constant 0 : i32
    return %c0_i32, %arg0 : i32, i32
  }
  func.func @transform_1(%arg0: i32) -> (i32, i32) {
    %c0_i32 = arith.constant 0 : i32
    %c0_i32_0 = arith.constant 0 : i32
    %c0_i32_1 = arith.constant 0 : i32
    return %c0_i32, %c0_i32_0 : i32, i32
  }
  func.func @transform_2(%arg0: i32) -> (i32, i32) {
    %c0_i32 = arith.constant 0 : i32
    %c0_i32_0 = arith.constant 0 : i32
    %c0_i32_1 = arith.constant 0 : i32
    return %c0_i32, %c0_i32_0 : i32, i32
  }
  func.func @transform_3(%arg0: i32) -> (i32, i32) {
    %c0_i32 = arith.constant 0 : i32
    %c0_i32_0 = arith.constant 0 : i32
    %c0_i32_1 = arith.constant 0 : i32
    return %c0_i32, %c0_i32_0 : i32, i32
  }
  func.func @transform_4(%arg0: i32) -> (i32, i32) {
    %c0_i32 = arith.constant 0 : i32
    %c0_i32_0 = arith.constant 0 : i32
    %c0_i32_1 = arith.constant 0 : i32
    return %c0_i32, %c0_i32_0 : i32, i32
  }
  func.func @transform_5(%arg0: i32) -> (i32, i32) {
    %c0_i32 = arith.constant 0 : i32
    %c0_i32_0 = arith.constant 0 : i32
    %c0_i32_1 = arith.constant 0 : i32
    return %c0_i32, %c0_i32_0 : i32, i32
  }
  func.func @transform_6(%arg0: i32) -> (i32, i32) {
    %c0_i32 = arith.constant 0 : i32
    %c0_i32_0 = arith.constant 0 : i32
    %c0_i32_1 = arith.constant 0 : i32
    return %c0_i32, %c0_i32_0 : i32, i32
  }
  func.func @transform_7(%arg0: i32) -> (i32, i32) {
    %c0_i32 = arith.constant 0 : i32
    %c0_i32_0 = arith.constant 0 : i32
    return %c0_i32, %arg0 : i32, i32
  }
}

</mosaic_0001>

<bundles_post_ra>
// kernel: tpu_custom_call.1
= control target key start
LH: loop header
LB: loop body
LE: loop exit
PB: predicated region body
PF: predicated region fallthrough
CT: control target
= control target key end

     0   :  { %vm206_vm0 = vcmask 1043456   ;;  %vm181_vm1 = vcmask 64512   ;;  %v849_v5 = vmov 0   ;;  %s1075_s0 = inlined_call_operand.vmem [shape: bf16[8,128], index: 0, kind: input, shape index: {}]   ;;  %s1076_s1 = inlined_call_operand.vmem [shape: bf16[128,8], index: 1, kind: input, shape index: {}]   ;;  %s1077_s2 = inlined_call_operand.vmem [shape: f32[128,1], index: 2, kind: input, shape index: {}]   ;;  %s1078_s3 = inlined_call_operand.vmem [shape: bf16[128,128], index: 3, kind: input, shape index: {}]   ;;  %s1079_s4 = inlined_call_operand.vmem [shape: f32[128,1], index: 4, kind: input, shape index: {}]   ;;  %s1080_s5 = inlined_call_operand.vmem [shape: bf16[8,128], index: 5, kind: input, shape index: {}]   ;;  %s1081_s6 = inlined_call_operand.vmem [shape: f32[8,1], index: 6, kind: input, shape index: {}]   ;;  %s1082_s7 = inlined_call_operand.hbm [shape: f32[8,128], index: 7, kind: output, shape index: {}]  }
   0x1   :  { %v44_v0 = vld [vmem:[%s1075_s0] sm:$0xf]  ;;  %v810_v3 = vld [vmem:[%s1076_s1 + $0x8] sm:$0xff]   ;;  %v811_v4 = vld [vmem:[%s1076_s1 + $0x10] sm:$0xff]   ;;  %807 = vset.pattern.permute.xlu0 %v849_v5  ;;  %808 = vset.pattern.permute.xlu1 %v849_v5 }
   0x2   :  { %v809_v1 = vld [vmem:[%s1076_s1] sm:$0xff]   ;;  %802 = vmatprep.subr.msk.bf16.mxu0 %vm206_vm0, %v44_v0  ;;  %v208_v2 = vsel %vm206_vm0, %v44_v0, 0  ;;  %v46_v7 = vld [vmem:[%s1077_s2 + $0x8] sm:$0xff]  ;;  %v812_v8 = vld [vmem:[%s1076_s1 + $0x18] sm:$0xff]  }
   0x3   :  { %733 = vmatpush3.bf16.msra.mxu0 %v208_v2  ;;  %734 = vmatprep.mubr.msk.bf16.mxu0 %vm181_vm1, %v809_v1  ;;  %v45_v6 = vld [vmem:[%s1077_s2] sm:$0xff]  ;;  %v47_v9 = vld [vmem:[%s1077_s2 + $0x10] sm:$0xff]  ;;  %v48_v11 = vld [vmem:[%s1077_s2 + $0x18] sm:$0xff] }
   0x4   :  { %63 = vperm.xlu0 %807, %v45_v6   ;;  %v813_v10 = vld [vmem:[%s1076_s1 + $0x20] sm:$0xff]   ;;  %73 = vperm.xlu1 %808, %v47_v9   ;;  %v50_v13 = vld [vmem:[%s1077_s2 + $0x28] sm:$0xff]  ;;  %v51_v14 = vld [vmem:[%s1077_s2 + $0x30] sm:$0xff] }
   0x5   :  { %v49_v12 = vld [vmem:[%s1077_s2 + $0x20] sm:$0xff]  ;;  %v814_v15 = vld [vmem:[%s1076_s1 + $0x28] sm:$0xff]   ;;  %v815_v16 = vld [vmem:[%s1076_s1 + $0x30] sm:$0xff]  }
   0x6   :  { %735 = vmatmul.mubr.msk.bf16.vlgmr.msra.gmra.mrb[0].mxu0 %vm181_vm1, %v810_v3  ;;  %v53_v17 = vld [vmem:[%s1077_s2 + $0x40] sm:$0xff]  ;;  %v52_v18 = vld [vmem:[%s1077_s2 + $0x38] sm:$0xff]  ;;  %v54_v19 = vld [vmem:[%s1077_s2 + $0x48] sm:$0xff] }
   0x7   :  { %738 = vmatprep.mubr.msk.bf16.mxu0 %vm181_vm1, %v811_v4  ;;  %v55_v20 = vld [vmem:[%s1077_s2 + $0x50] sm:$0xff]  ;;  %v816_v21 = vld [vmem:[%s1076_s1 + $0x38] sm:$0xff]  }
   0x8   :  { %68 = vperm.xlu0 %807, %v46_v7   ;;  %78 = vperm.xlu1 %808, %v48_v11  }
   0xc   :  { %83 = vperm.xlu0 %807, %v49_v12   ;;  %88 = vperm.xlu1 %808, %v50_v13  }
   0xe   :  { %739 = vmatmul.mubr.msk.bf16.gmra.mrb[4].mxu0 %vm181_vm1, %v812_v8 }
   0xf   :  { %742 = vmatprep.mubr.msk.bf16.mxu0 %vm181_vm1, %v813_v10 }
  0x10   :  { %93 = vperm.xlu0 %807, %v51_v14   ;;  %98 = vperm.xlu1 %808, %v52_v18  }
  0x14   :  { %103 = vperm.xlu0 %807, %v53_v17  }
  0x16   :  { %743 = vmatmul.mubr.msk.bf16.gmra.mrb[8].mxu0 %vm181_vm1, %v814_v15 }
  0x17   :  { %746 = vmatprep.mubr.msk.bf16.mxu0 %vm181_vm1, %v815_v16 }
  0x18   :  { %12 = vsyncpa [#allocation3], 0  ;;  %108 = vperm.xlu1 %808, %v54_v19   ;;  %113 = vperm.xlu0 %807, %v55_v20   ;;  %v56_v22 = vld [vmem:[%s1077_s2 + $0x58] sm:$0xff]  ;;  %v57_v23 = vld [vmem:[%s1077_s2 + $0x60] sm:$0xff]  ;;  %vm851_vm2 = vmmov 0   ;;  %s852_s22 = smov [#allocation2]  }
  0x19   :  { %v58_v24 = vld [vmem:[%s1077_s2 + $0x68] sm:$0xff]  ;;  %v59_v25 = vld [vmem:[%s1077_s2 + $0x70] sm:$0xff]  ;;  %v60_v26 = vld [vmem:[%s1077_s2 + $0x78] sm:$0xff]  ;;  %s666_s23 = sshll.u32 %s852_s22, 4  ;;  %s667_s23 = int_to_ptr.vmem [resolvable:$true] %s666_s23 }
  0x1a   :  { %v347_v27 = vld [vmem:[%s1079_s4] sm:$0xff]  ;;  %v348_v28 = vld [vmem:[%s1079_s4 + $0x8] sm:$0xff]  ;;  %v349_v29 = vld [vmem:[%s1079_s4 + $0x10] sm:$0xff]  ;;  %s825_s24 = scalar_lea.vmem %s667_s23, 128  ;;  %p830_p1 = scmp.lt.s32.totalorder %s667_s23, %s667_s23 }
  0x1b   :  { %v350_v30 = vld [vmem:[%s1079_s4 + $0x18] sm:$0xff]  ;;  %v351_v31 = vld [vmem:[%s1079_s4 + $0x20] sm:$0xff]  ;;  %v352_v32 = vld [vmem:[%s1079_s4 + $0x28] sm:$0xff]  ;;  %p826_p0 = scmp.ne.s32.totalorder %s667_s23, %s825_s24  ;;  %p831_p2 = scmp.lt.s32.totalorder %s825_s24, %s825_s24 }
  0x1c   :  { %118 = vperm.xlu1 %808, %v56_v22   ;;  %123 = vperm.xlu0 %807, %v57_v23   ;;  %v353_v33 = vld [vmem:[%s1079_s4 + $0x30] sm:$0xff]  ;;  %v354_v34 = vld [vmem:[%s1079_s4 + $0x38] sm:$0xff]  ;;  %v355_v35 = vld [vmem:[%s1079_s4 + $0x40] sm:$0xff] }
  0x1d   :  { %v356_v36 = vld [vmem:[%s1079_s4 + $0x48] sm:$0xff]  ;;  %v357_v37 = vld [vmem:[%s1079_s4 + $0x50] sm:$0xff]  ;;  %v358_v38 = vld [vmem:[%s1079_s4 + $0x58] sm:$0xff]  ;;  %p832_p3 = por %p831_p2, %p830_p1 }
  0x1e   :  { %747 = vmatmul.mubr.msk.bf16.gmra.mrb[12].mxu0 %vm181_vm1, %v816_v21  ;;  %v359_v39 = vld [vmem:[%s1079_s4 + $0x60] sm:$0xff]  ;;  %v360_v40 = vld [vmem:[%s1079_s4 + $0x68] sm:$0xff]  ;;  %v361_v41 = vld [vmem:[%s1079_s4 + $0x70] sm:$0xff] }
  0x1f   :  { %v362_v42 = vld [vmem:[%s1079_s4 + $0x78] sm:$0xff]  ;;  %v613_v43 = vld [vmem:[%s1081_s6] sm:$0xff]  ;;  %p833_p4 = pnand %p832_p3, %p826_p0 }
  0x20   :  { %128 = vperm.xlu1 %808, %v58_v24   ;;  %133 = vperm.xlu0 %807, %v59_v25   ;;  %v817_v44 = vld [vmem:[%s1078_s3] sm:$0xff]  }
  0x21   :  { %766 = vmatprep.mubr.bf16.mxu1 %v817_v44 }
  0x24   :  { %138 = vperm.xlu1 %808, %v60_v26   ;;  %365 = vperm.xlu0 %807, %v347_v27  }
  0x28   :  { %370 = vperm.xlu1 %808, %v348_v28   ;;  %375 = vperm.xlu0 %807, %v349_v29  }
  0x2c   :  { %380 = vperm.xlu1 %808, %v350_v30   ;;  %385 = vperm.xlu0 %807, %v351_v31  }
  0x30   :  { %390 = vperm.xlu1 %808, %v352_v32   ;;  %395 = vperm.xlu0 %807, %v353_v33  }
  0x34   :  { %400 = vperm.xlu1 %808, %v354_v34   ;;  %405 = vperm.xlu0 %807, %v355_v35  }
  0x38   :  { %410 = vperm.xlu1 %808, %v356_v36   ;;  %415 = vperm.xlu0 %807, %v357_v37  }
  0x3c   :  { %420 = vperm.xlu1 %808, %v358_v38   ;;  %425 = vperm.xlu0 %807, %v359_v39  }
  0x40   :  { %430 = vperm.xlu1 %808, %v360_v40   ;;  %435 = vperm.xlu0 %807, %v361_v41  }
  0x44   :  { %440 = vperm.xlu1 %808, %v362_v42   ;;  %616 = vperm.xlu0 %807, %v613_v43  }
  0x83   :  { %v64_v45 = vpop.permute.xlu0 %63  ;;  %v74_v46 = vpop.permute.xlu1 %73 }
  0x87   :  { %v69_v47 = vpop.permute.xlu0 %68  ;;  %v79_v48 = vpop.permute.xlu1 %78 }
  0x8b   :  { %v84_v49 = vpop.permute.xlu0 %83  ;;  %v89_v50 = vpop.permute.xlu1 %88 }
  0x8f   :  { %v94_v51 = vpop.permute.xlu0 %93  ;;  %v99_v55 = vpop.permute.xlu1 %98 }
  0x93   :  { %v104_v63 = vpop.permute.xlu0 %103 }
  0x97   :  { %v109_v3 = vpop.permute.xlu1 %108  ;;  %v114_v12 = vpop.permute.xlu0 %113 }
  0x9b   :  { %v119_v16 = vpop.permute.xlu1 %118  ;;  %v124_v24 = vpop.permute.xlu0 %123 }
  0x9f   :  { %v129_v29 = vpop.permute.xlu1 %128  ;;  %v134_v36 = vpop.permute.xlu0 %133 }
  0xa3   :  { %v139_v41 = vpop.permute.xlu1 %138 }
  0xd9   :  { %v736_v52 = vpop.f32.mrb[0].mxu0 }
  0xda   :  { %v253_v53 = vadd.f32 %v736_v52, %v74_v46  ;;  %v244_v54 = vpop.f32.mrb[1].mxu0 }
  0xdb   :  { %v245_v56 = vadd.f32 %v244_v54, %v64_v45  ;;  %v737_v57 = vpop.f32.mrb[2].mxu0  ;;  %v819_v54 = vld [vmem:[%s1078_s3 + $0x10] sm:$0xff]  }
  0xdc   :  { %v256_v58 = vadd.f32 %v737_v57, %v79_v48  ;;  %v247_v59 = vpop.f32.mrb[3].mxu0  ;;  %v309_v61 = vmax.f32 %v253_v53, 0.0  ;;  %v818_v53 = vld [vmem:[%s1078_s3 + $0x8] sm:$0xff]  }
  0xdd   :  { %v248_v60 = vadd.f32 %v247_v59, %v69_v47  ;;  %v307_v0 = vmax.f32 %v245_v56, 0.0  ;;  %v821_v56 = vld [vmem:[%s1078_s3 + $0x20] sm:$0xff]   ;;  %v822_v57 = vld [vmem:[%s1078_s3 + $0x28] sm:$0xff]   ;;  %v824_v59 = vld [vmem:[%s1078_s3 + $0x38] sm:$0xff]  }
  0xde   :  { %v310_v62 = vmax.f32 %v256_v58, 0.0  ;;  %v823_v58 = vld [vmem:[%s1078_s3 + $0x30] sm:$0xff]  }
  0xdf   :  { %v308_v1 = vmax.f32 %v248_v60, 0.0  ;;  %v850_v60 = vmov 0.0  }
  0xe0   :  { %v340_v2 = vpack.c.bf16 %v310_v62, %v309_v61  ;;  %782 = vmatprep.subr.bf16.mxu0 %v850_v60  ;;  %798 = vmatprep.mubr.msk.bf16.mxu0 %vm851_vm2, %v850_v60  ;;  %v366_v61 = vpop.permute.xlu0 %365  ;;  %v371_v62 = vpop.permute.xlu1 %370 }
  0xe1   :  { %v740_v4 = vpop.f32.mrb[4].mxu0  ;;  %v339_v5 = vpack.c.bf16 %v308_v1, %v307_v0 }
  0xe2   :  { %v269_v6 = vadd.f32 %v740_v4, %v94_v51  ;;  %v260_v7 = vpop.f32.mrb[5].mxu0 }
  0xe3   :  { %v261_v8 = vadd.f32 %v260_v7, %v84_v49  ;;  %v741_v9 = vpop.f32.mrb[6].mxu0  ;;  %750 = vmatprep.subr.bf16.mxu1 %v339_v5 }
  0xe4   :  { %v272_v10 = vadd.f32 %v741_v9, %v99_v55  ;;  %v263_v11 = vpop.f32.mrb[7].mxu0  ;;  %751 = vmatpush3.bf16.msra.mxu1 %v339_v5  ;;  %v313_v14 = vmax.f32 %v269_v6, 0.0  ;;  %v820_v55 = vld [vmem:[%s1078_s3 + $0x18] sm:$0xff]   ;;  %v381_v0 = vpop.permute.xlu1 %380 }
  0xe5   :  { %v264_v13 = vadd.f32 %v263_v11, %v89_v50  ;;  %752 = vmatprep.subr.bf16.mxu1 %v340_v2  ;;  %v311_v17 = vmax.f32 %v261_v8, 0.0 }
  0xe6   :  { %v314_v15 = vmax.f32 %v272_v10, 0.0 }
  0xe7   :  { %v312_v18 = vmax.f32 %v264_v13, 0.0 }
  0xe8   :  { %v342_v19 = vpack.c.bf16 %v314_v15, %v313_v14  ;;  %753 = vmatpush3.bf16.msra.mxu1 %v340_v2  ;;  %v391_v2 = vpop.permute.xlu1 %390 }
  0xe9   :  { %v341_v20 = vpack.c.bf16 %v312_v18, %v311_v17  ;;  %v744_v21 = vpop.f32.mrb[8].mxu0 }
  0xea   :  { %v285_v22 = vadd.f32 %v744_v21, %v114_v12  ;;  %v276_v23 = vpop.f32.mrb[9].mxu0 }
  0xeb   :  { %v277_v25 = vadd.f32 %v276_v23, %v104_v63  ;;  %v745_v26 = vpop.f32.mrb[10].mxu0  ;;  %754 = vmatprep.subr.bf16.mxu1 %v341_v20  ;;  %v376_v63 = vpop.permute.xlu0 %375 }
  0xec   :  { %v288_v27 = vadd.f32 %v745_v26, %v119_v16  ;;  %v279_v28 = vpop.f32.mrb[11].mxu0  ;;  %755 = vmatpush3.bf16.msra.mxu1 %v341_v20  ;;  %v317_v31 = vmax.f32 %v285_v22, 0.0  ;;  %v401_v7 = vpop.permute.xlu1 %400 }
  0xed   :  { %v280_v30 = vadd.f32 %v279_v28, %v109_v3  ;;  %756 = vmatprep.subr.bf16.mxu1 %v342_v19  ;;  %v315_v33 = vmax.f32 %v277_v25, 0.0 }
  0xee   :  { %v318_v32 = vmax.f32 %v288_v27, 0.0 }
  0xef   :  { %v316_v34 = vmax.f32 %v280_v30, 0.0  ;;  %v386_v1 = vpop.permute.xlu0 %385 }
  0xf0   :  { %v344_v35 = vpack.c.bf16 %v318_v32, %v317_v31  ;;  %757 = vmatpush3.bf16.msra.mxu1 %v342_v19  ;;  %v411_v19 = vpop.permute.xlu1 %410 }
  0xf1   :  { %v343_v37 = vpack.c.bf16 %v316_v34, %v315_v33  ;;  %v748_v38 = vpop.f32.mrb[12].mxu0 }
  0xf2   :  { %v301_v39 = vadd.f32 %v748_v38, %v134_v36  ;;  %v292_v40 = vpop.f32.mrb[13].mxu0 }
  0xf3   :  { %v293_v42 = vadd.f32 %v292_v40, %v124_v24  ;;  %v749_v43 = vpop.f32.mrb[14].mxu0  ;;  %758 = vmatprep.subr.bf16.mxu1 %v343_v37  ;;  %v396_v3 = vpop.permute.xlu0 %395 }
  0xf4   :  { %v304_v44 = vadd.f32 %v749_v43, %v139_v41  ;;  %v295_v45 = vpop.f32.mrb[15].mxu0  ;;  %759 = vmatpush3.bf16.msra.mxu1 %v343_v37  ;;  %v321_v47 = vmax.f32 %v301_v39, 0.0  ;;  %v421_v32 = vpop.permute.xlu1 %420 }
  0xf5   :  { %v296_v46 = vadd.f32 %v295_v45, %v129_v29  ;;  %760 = vmatprep.subr.bf16.mxu1 %v344_v35  ;;  %v319_v49 = vmax.f32 %v293_v42, 0.0 }
  0xf6   :  { %v322_v48 = vmax.f32 %v304_v44, 0.0 }
  0xf7   :  { %v320_v50 = vmax.f32 %v296_v46, 0.0  ;;  %v406_v15 = vpop.permute.xlu0 %405 }
  0xf8   :  { %v346_v51 = vpack.c.bf16 %v322_v48, %v321_v47  ;;  %761 = vmatpush3.bf16.msra.mxu1 %v344_v35  ;;  %v431_v45 = vpop.permute.xlu1 %430 }
  0xf9   :  { %v345_v52 = vpack.c.bf16 %v320_v50, %v319_v49 }
  0xfb   :  { %762 = vmatprep.subr.bf16.mxu1 %v345_v52  ;;  %v416_v28 = vpop.permute.xlu0 %415 }
  0xfc   :  { %763 = vmatpush3.bf16.msra.mxu1 %v345_v52 }
  0xfd   :  { %764 = vmatprep.subr.bf16.mxu1 %v346_v51 }
  0xff   :  { %v426_v40 = vpop.permute.xlu0 %425 }
 0x100   :  { %765 = vmatpush3.bf16.msra.mxu1 %v346_v51 }
 0x103   :  { %767 = vmatmul.mubr.bf16.vlgmr.msra.gmra.mrb[0].mxu1 %v818_v53  ;;  %v436_v52 = vpop.permute.xlu0 %435 }
 0x104   :  { %770 = vmatprep.mubr.bf16.mxu1 %v819_v54 }
 0x10b   :  { %771 = vmatmul.mubr.bf16.gmra.mrb[4].mxu1 %v820_v55 }
 0x10c   :  { %774 = vmatprep.mubr.bf16.mxu1 %v821_v56 }
 0x113   :  { %775 = vmatmul.mubr.bf16.gmra.mrb[8].mxu1 %v822_v57  ;;  %v441_v57 = vpop.permute.xlu1 %440 }
 0x114   :  { %778 = vmatprep.mubr.bf16.mxu1 %v823_v58 }
 0x11b   :  { %779 = vmatmul.mubr.bf16.gmra.mrb[12].mxu1 %v824_v59 }
 0x1d6   :  { %v768_v4 = vpop.f32.mrb[0].mxu1 }
 0x1d7   :  { %v534_v5 = vadd.f32 %v768_v4, %v376_v63  ;;  %v525_v6 = vpop.f32.mrb[1].mxu1 }
 0x1d8   :  { %v526_v8 = vadd.f32 %v525_v6, %v366_v61  ;;  %v769_v9 = vpop.f32.mrb[2].mxu1  ;;  %v604_v6 = vld [vmem:[%s1080_s5] sm:$0xf] }
 0x1d9   :  { %v537_v10 = vadd.f32 %v769_v9, %v381_v0  ;;  %v528_v11 = vpop.f32.mrb[3].mxu1  ;;  %v590_v13 = vmax.f32 %v534_v5, 0.0 }
 0x1da   :  { %v529_v12 = vadd.f32 %v528_v11, %v371_v62  ;;  %v588_v16 = vmax.f32 %v526_v8, 0.0 }
 0x1db   :  { %v591_v14 = vmax.f32 %v537_v10, 0.0 }
 0x1dc   :  { %v589_v17 = vmax.f32 %v529_v12, 0.0 }
 0x1dd   :  { %v606_v18 = vpack.c.bf16 %v591_v14, %v590_v13 }
 0x1de   :  { %v605_v20 = vpack.c.bf16 %v589_v17, %v588_v16  ;;  %v772_v21 = vpop.f32.mrb[4].mxu1 }
 0x1df   :  { %v550_v22 = vadd.f32 %v772_v21, %v396_v3  ;;  %v541_v23 = vpop.f32.mrb[5].mxu1 }
 0x1e0   :  { %v542_v24 = vadd.f32 %v541_v23, %v386_v1  ;;  %v773_v25 = vpop.f32.mrb[6].mxu1  ;;  %783 = vmatpush3.bf16.msra.mxu0 %v605_v20 }
 0x1e1   :  { %v553_v26 = vadd.f32 %v773_v25, %v401_v7  ;;  %v544_v27 = vpop.f32.mrb[7].mxu1  ;;  %784 = vmatprep.subr.bf16.mxu0 %v850_v60  ;;  %v594_v30 = vmax.f32 %v550_v22, 0.0  ;;  %v617_v7 = vpop.permute.xlu0 %616 }
 0x1e2   :  { %v545_v29 = vadd.f32 %v544_v27, %v391_v2  ;;  %v592_v33 = vmax.f32 %v542_v24, 0.0 }
 0x1e3   :  { %v595_v31 = vmax.f32 %v553_v26, 0.0 }
 0x1e4   :  { %v593_v34 = vmax.f32 %v545_v29, 0.0  ;;  %785 = vmatpush3.bf16.msra.mxu0 %v606_v18 }
 0x1e5   :  { %v608_v35 = vpack.c.bf16 %v595_v31, %v594_v30  ;;  %786 = vmatprep.subr.bf16.mxu0 %v850_v60 }
 0x1e6   :  { %v607_v36 = vpack.c.bf16 %v593_v34, %v592_v33  ;;  %v776_v37 = vpop.f32.mrb[8].mxu1 }
 0x1e7   :  { %v566_v38 = vadd.f32 %v776_v37, %v416_v28  ;;  %v557_v39 = vpop.f32.mrb[9].mxu1 }
 0x1e8   :  { %v558_v41 = vadd.f32 %v557_v39, %v406_v15  ;;  %v777_v42 = vpop.f32.mrb[10].mxu1  ;;  %787 = vmatpush3.bf16.msra.mxu0 %v607_v36 }
 0x1e9   :  { %v569_v43 = vadd.f32 %v777_v42, %v421_v32  ;;  %v560_v44 = vpop.f32.mrb[11].mxu1  ;;  %788 = vmatprep.subr.bf16.mxu0 %v850_v60  ;;  %v598_v47 = vmax.f32 %v566_v38, 0.0 }
 0x1ea   :  { %v561_v46 = vadd.f32 %v560_v44, %v411_v19  ;;  %v596_v49 = vmax.f32 %v558_v41, 0.0 }
 0x1eb   :  { %v599_v48 = vmax.f32 %v569_v43, 0.0 }
 0x1ec   :  { %v597_v50 = vmax.f32 %v561_v46, 0.0  ;;  %789 = vmatpush3.bf16.msra.mxu0 %v608_v35 }
 0x1ed   :  { %v610_v51 = vpack.c.bf16 %v599_v48, %v598_v47  ;;  %790 = vmatprep.subr.bf16.mxu0 %v850_v60 }
 0x1ee   :  { %v609_v53 = vpack.c.bf16 %v597_v50, %v596_v49  ;;  %v780_v54 = vpop.f32.mrb[12].mxu1 }
 0x1ef   :  { %v582_v55 = vadd.f32 %v780_v54, %v436_v52  ;;  %v573_v56 = vpop.f32.mrb[13].mxu1 }
 0x1f0   :  { %v574_v58 = vadd.f32 %v573_v56, %v426_v40  ;;  %v781_v59 = vpop.f32.mrb[14].mxu1  ;;  %791 = vmatpush3.bf16.msra.mxu0 %v609_v53 }
 0x1f1   :  { %v585_v61 = vadd.f32 %v781_v59, %v441_v57  ;;  %v576_v62 = vpop.f32.mrb[15].mxu1  ;;  %792 = vmatprep.subr.bf16.mxu0 %v850_v60  ;;  %v602_v0 = vmax.f32 %v582_v55, 0.0 }
 0x1f2   :  { %v577_v63 = vadd.f32 %v576_v62, %v431_v45  ;;  %v600_v2 = vmax.f32 %v574_v58, 0.0 }
 0x1f3   :  { %v603_v1 = vmax.f32 %v585_v61, 0.0 }
 0x1f4   :  { %v601_v3 = vmax.f32 %v577_v63, 0.0  ;;  %793 = vmatpush3.bf16.msra.mxu0 %v610_v51 }
 0x1f5   :  { %v612_v4 = vpack.c.bf16 %v603_v1, %v602_v0  ;;  %794 = vmatprep.subr.bf16.mxu0 %v850_v60 }
 0x1f6   :  { %v611_v5 = vpack.c.bf16 %v601_v3, %v600_v2 }
 0x1f8   :  { %795 = vmatpush3.bf16.msra.mxu0 %v611_v5 }
 0x1f9   :  { %796 = vmatprep.subr.bf16.mxu0 %v850_v60 }
 0x1fc   :  { %797 = vmatpush3.bf16.msra.mxu0 %v612_v4 }
 0x1ff   :  { %799 = vmatmul.mubr.bf16.vlgmr.msra.gmra.mrb[16].mxu0 %v604_v6 }
 0x2d2   :  { %v653_v8 = vpop.f32.mrb[16].mxu0 }
 0x2d3   :  { %v654_v9 = vadd.f32 %v653_v8, %v617_v7  ;;  %v800_v10 = vpop.f32.mrb[17].mxu0 }
 0x2d4   :  { %v656_v11 = vpop.f32.mrb[18].mxu0 }
 0x2d5   :  { %659 = vst [vmem:[#allocation2] sm:$0xff] %v654_v9  ;;  %v801_v12 = vpop.f32.mrb[19].mxu0 }
 0x2d6   :  { %836 = shalt.err (!%p833_p4)
}
 0x2d7   :  { %s837_s26 = scalar_lea.hbm %s1082_s7, 128 }
 0x2d8   :  { %p838_p5 = scmp.ne.s32.totalorder %s1082_s7, %s837_s26  ;;  %p841_p6 = scmp.lt.u32.totalorder %s837_s26, %s1082_s7 }
 0x2da   :  { %p843_p7 = pnand %p841_p6, %p838_p5 }
 0x2dc   :  { %846 = shalt.err (!%p843_p7)
}
 0x2dd   :  { %669 = dma.vmem_to_hbm [thread:$0]  %s667_s23, 128, %s1082_s7, [#allocation3]  }
 0x2de   :  { %847 = dma.done.wait [#allocation3], 128  }
 0x2df   :  { %848 = vsyncadd [#allocation3], 4294967168 }
 0x2e0   :  { %673 = vsyncpa [#allocation3], 1 }

</bundles_post_ra>
